<compile_context>
chip_gen: v7x
topology: tpu7x:2x2x1
jax: 0.10.0
libtpu: 0.0.40
codegen_flags: <defaults>
</compile_context>

<pallas_src>
import jax
import jax.numpy as jnp
import numpy as np
from jax import lax
from jax.experimental import pallas as pl
from jax.experimental.pallas import tpu as pltpu

LANES = 128


def _round_up(x, m):
    return (x + m - 1) // m * m


def _make_kernel(seq_k, k_dim, block_b, slab):
    """Fused conv(all filter sizes)+bias + ReLU + max-pool + FC, slab-wise."""
    n_slabs = block_b // slab

    def kernel(x_ref, w_ref, mask_ref, fcw_ref, fcb_ref, out_ref):
        # x_ref   : [TB, seq_k, K]  bf16  im2col windows (K = fs_max*(emb+1))
        # w_ref   : [K, 128]        bf16  all convs fused along lanes, bias folded
        # mask_ref: [seq_k, 128]    f32   1.0 where conv position valid per filter
        # fcw_ref : [128, 128]      bf16  FC weight, lane-padded
        # fcb_ref : [1, 128]        f32
        # out_ref : [TB, 128]       f32   lane-dense output block
        def body(i, carry):
            r0 = pl.multiple_of(i * slab, slab)
            x = x_ref[pl.ds(r0, slab)]                      # [slab, seq_k, K]
            xm = x.reshape(slab * seq_k, k_dim)             # tile-aligned collapse
            conv = jnp.dot(xm, w_ref[...],
                           preferred_element_type=jnp.float32)
            conv = conv.reshape(slab, seq_k, LANES) * mask_ref[...]
            # Masked max then ReLU: relu commutes with max, and masked (=0)
            # entries never exceed a positive true max; a non-positive true
            # max relus to 0 anyway.  (Relies on ReLU >= 0.)
            pooled = jnp.maximum(jnp.max(conv, axis=1), 0.0)    # [slab, 128]
            # TODO(synk): dropout is identity at inference (eval mode);
            # training-mode random masking is not implemented here.
            out = jnp.dot(pooled.astype(fcw_ref.dtype), fcw_ref[...],
                          preferred_element_type=jnp.float32) + fcb_ref[...]
            out_ref[pl.ds(r0, slab), :] = out
            return carry

        lax.fori_loop(0, n_slabs, body, 0, unroll=True)

    return kernel


def textcnn_forward(text, params, filter_sizes, block_b=256):
    """text: int32 [seq_len, batch] (PyTorch convention) -> [batch, output_dim]."""
    emb_table = params["embedding"]        # [vocab, emb_dim]  f32
    conv_ws = params["conv_w"]             # list of [fs, emb_dim, n_filters]
    conv_bs = params["conv_b"]             # list of [1, n_filters]
    fc_w = params["fc_w"]                  # [n_convs*n_filters, output_dim]
    fc_b = params["fc_b"]                  # [1, output_dim]

    filter_sizes = tuple(int(fs) for fs in filter_sizes)
    n_convs = len(filter_sizes)
    n_filters = conv_ws[0].shape[-1]
    out_dim = fc_w.shape[-1]
    fs_max = max(filter_sizes)
    feat = n_convs * n_filters
    vocab, emb_dim = emb_table.shape
    assert feat <= LANES and out_dim <= LANES, "lane padding width exceeded"

    seq_len, batch = text.shape
    assert seq_len >= fs_max, "sequence shorter than largest filter"

    # Batch block: multiple of 8 rows; prefer >=2 grid steps (v7x has 2 TCs).
    if batch >= 2 * block_b:
        tb = block_b
    else:
        tb = min(block_b, max(8, _round_up((batch + 1) // 2, 8)))
    batch_pad = _round_up(batch, tb)
    slab = 16 if tb % 16 == 0 else 8

    seq_k = _round_up(seq_len, 16)               # bf16 sublane packing
    k_dim = fs_max * (emb_dim + 1)               # +1 = constant-1 bias column
    pad_id = vocab                               # extra zero-embedding row

    # ---- device-side glue: ids -> im2col LHS in ONE gather pass ----
    ids = text.T.astype(jnp.int32)                                   # [batch, seq]
    ids = jnp.pad(ids,
                  ((0, batch_pad - batch),
                   (0, seq_k + fs_max - 1 - seq_len)),
                  constant_values=pad_id)
    offsets = jnp.arange(seq_k)[:, None] + jnp.arange(fs_max)[None, :]
    win_ids = ids[:, offsets]                    # [batch_pad, seq_k, fs_max]

    # Embedding table augmented with a constant-1 column (folds conv bias into
    # the fused matmul) and a zero PAD row; cast to bf16 once.
    ones_col = jnp.ones((vocab, 1), emb_table.dtype)
    pad_row = jnp.concatenate([jnp.zeros((1, emb_dim), emb_table.dtype),
                               jnp.ones((1, 1), emb_table.dtype)], axis=1)
    table_aug = jnp.concatenate(
        [jnp.concatenate([emb_table, ones_col], axis=1), pad_row],
        axis=0).astype(jnp.bfloat16)             # [vocab+1, emb+1]

    x = table_aug[win_ids]                       # [batch_pad, seq_k, fs_max, emb+1]
    x = x.reshape(batch_pad, seq_k, k_dim)       # im2col LHS, bf16

    # ---- tiny host-side fused parameters ----
    w_fused = np.zeros((k_dim, LANES), np.float32)
    mask = np.zeros((seq_k, LANES), np.float32)
    for c, fs in enumerate(filter_sizes):
        col = c * n_filters
        wc = np.asarray(conv_ws[c], np.float32)          # [fs, emb, nf]
        for r in range(fs):
            base = r * (emb_dim + 1)
            w_fused[base:base + emb_dim, col:col + n_filters] = wc[r]
        # conv bias rides on the slot-0 constant-1 column of the table
        w_fused[emb_dim, col:col + n_filters] = np.asarray(conv_bs[c]).reshape(-1)
        mask[: seq_len - fs + 1, col:col + n_filters] = 1.0
    fcw_pad = np.zeros((LANES, LANES), np.float32)
    fcw_pad[:feat, :out_dim] = np.asarray(fc_w, np.float32)
    fcb_pad = np.zeros((1, LANES), np.float32)
    fcb_pad[0, :out_dim] = np.asarray(fc_b, np.float32).reshape(-1)

    w_fused = jnp.asarray(w_fused, jnp.bfloat16)
    mask = jnp.asarray(mask, jnp.float32)
    fcw_pad = jnp.asarray(fcw_pad, jnp.bfloat16)
    fcb_pad = jnp.asarray(fcb_pad, jnp.float32)

    kernel = _make_kernel(seq_k, k_dim, tb, slab)

    out = pl.pallas_call(
        kernel,
        out_shape=jax.ShapeDtypeStruct((batch_pad, LANES), jnp.float32),
        grid_spec=pltpu.PrefetchScalarGridSpec(
            num_scalar_prefetch=0,
            grid=(batch_pad // tb,),
            in_specs=[
                pl.BlockSpec((tb, seq_k, k_dim), lambda b: (b, 0, 0)),
                pl.BlockSpec((k_dim, LANES), lambda b: (0, 0)),
                pl.BlockSpec((seq_k, LANES), lambda b: (0, 0)),
                pl.BlockSpec((LANES, LANES), lambda b: (0, 0)),
                pl.BlockSpec((1, LANES), lambda b: (0, 0)),
            ],
            out_specs=pl.BlockSpec((tb, LANES), lambda b: (b, 0)),
        ),
        compiler_params=pltpu.CompilerParams(
            dimension_semantics=("parallel",)),
    )(x, w_fused, mask, fcw_pad, fcb_pad)

    return out[:batch, :out_dim]


def init_params(key, vocab_size, embedding_dim, n_filters, filter_sizes, output_dim):
    keys = jax.random.split(key, 3 + 2 * len(filter_sizes))
    params = {
        "embedding": 0.1 * jax.random.normal(
            keys[0], (vocab_size, embedding_dim), jnp.float32),
        "conv_w": [],
        "conv_b": [],
    }
    for i, fs in enumerate(filter_sizes):
        params["conv_w"].append(0.1 * jax.random.normal(
            keys[1 + 2 * i], (fs, embedding_dim, n_filters), jnp.float32))
        params["conv_b"].append(0.1 * jax.random.normal(
            keys[2 + 2 * i], (1, n_filters), jnp.float32))
    in_features = len(filter_sizes) * n_filters
    params["fc_w"] = 0.1 * jax.random.normal(
        keys[-2], (in_features, output_dim), jnp.float32)
    params["fc_b"] = 0.1 * jax.random.normal(
        keys[-1], (1, output_dim), jnp.float32)
    return params


def reference_forward(text, params, filter_sizes):
    """Pure-JAX f32 reference mirroring the PyTorch forward (eval mode)."""
    embedded = params["embedding"][text.T]                  # [batch, seq, emb]
    pooled = []
    for fs, w, b in zip(filter_sizes, params["conv_w"], params["conv_b"]):
        L = embedded.shape[1] - fs + 1
        acc = jnp.zeros((embedded.shape[0], L, w.shape[-1]), jnp.float32)
        for r in range(fs):
            acc = acc + jnp.einsum("bld,df->blf", embedded[:, r:r + L, :], w[r])
        acc = jax.nn.relu(acc + b[None])
        pooled.append(jnp.max(acc, axis=1))
    cat = jnp.concatenate(pooled, axis=1)
    return cat @ params["fc_w"] + params["fc_b"]


if __name__ == "__main__":
    vocab_size, embedding_dim = 50, 32
    n_filters, filter_sizes = 8, (3, 4, 5)
    output_dim = 4
    seq_len, batch = 16, 2

    key = jax.random.PRNGKey(0)
    k_params, k_text = jax.random.split(key)
    params = init_params(k_params, vocab_size, embedding_dim,
                         n_filters, filter_sizes, output_dim)
    text = jax.random.randint(k_text, (seq_len, batch), 0, vocab_size,
                              dtype=jnp.int32)

    out = textcnn_forward(text, params, filter_sizes)
    jax.block_until_ready(out)

    ref = reference_forward(text, params, filter_sizes)
    assert out.shape == (batch, output_dim)
    # Kernel feeds the MXU bf16 (f32 accumulation); compare against the f32
    # reference with a tolerance covering bf16 rounding.
    assert jnp.allclose(out, ref, atol=2e-2, rtol=2e-2), "mismatch vs reference"

    print("KERNEL_OK")
</pallas_src>

<mosaic_0001>
module attributes {stable_mosaic.version = 11 : i64} {
  func.func @kernel(%arg0: i32, %arg1: memref<8x16x165xbf16, #tpu.memory_space<vmem>>, %arg2: memref<165x128xbf16, #tpu.memory_space<vmem>>, %arg3: memref<16x128xf32, #tpu.memory_space<vmem>>, %arg4: memref<128x128xbf16, #tpu.memory_space<vmem>>, %arg5: memref<1x128xf32, #tpu.memory_space<vmem>>, %arg6: memref<8x128xf32, #tpu.memory_space<vmem>>) attributes {dimension_semantics = [#tpu.dimension_semantics<parallel>], iteration_bounds = array<i64: 1>, scalar_prefetch = 0 : i64, scratch_operands = 0 : i64, tpu.core_type = #tpu.core_type<tc>, window_params = [{transform_indices = @transform_0, window_bounds = array<i64: 8, 16, 165>}, {pipeline_mode = #tpu.pipeline_mode<synchronous>, transform_indices = @transform_1, window_bounds = array<i64: 165, 128>}, {pipeline_mode = #tpu.pipeline_mode<synchronous>, transform_indices = @transform_2, window_bounds = array<i64: 16, 128>}, {pipeline_mode = #tpu.pipeline_mode<synchronous>, transform_indices = @transform_3, window_bounds = array<i64: 128, 128>}, {pipeline_mode = #tpu.pipeline_mode<synchronous>, transform_indices = @transform_4, window_bounds = array<i64: 1, 128>}, {transform_indices = @transform_5, window_bounds = array<i64: 8, 128>}]} {
    %c0_i32 = arith.constant 0 : i32
    %c8_i32 = arith.constant 8 : i32
    %0 = arith.muli %c0_i32, %c8_i32 : i32
    %1 = tpu.assume_multiple %0, 8 : i32
    %2 = arith.index_cast %1 : i32 to index
    %c0 = arith.constant 0 : index
    %c0_0 = arith.constant 0 : index
    %3 = vector.load %arg1[%2, %c0, %c0_0] : memref<8x16x165xbf16, #tpu.memory_space<vmem>>, vector<8x16x165xbf16>
    %4 = vector.shape_cast %3 : vector<8x16x165xbf16> to vector<128x165xbf16>
    %c0_1 = arith.constant 0 : index
    %c0_2 = arith.constant 0 : index
    %5 = vector.load %arg2[%c0_1, %c0_2] : memref<165x128xbf16, #tpu.memory_space<vmem>>, vector<165x128xbf16>
    %cst = arith.constant dense<0.000000e+00> : vector<128x128xf32>
    %6 = tpu.matmul %4, %5, %cst {dimension_numbers = #tpu.dot_dimension_numbers<[1], [0], [0], [1], [0, 0, 1, 1], [], []>} : vector<128x165xbf16>, vector<165x128xbf16>, vector<128x128xf32> -> vector<128x128xf32>
    %7 = vector.shape_cast %6 : vector<128x128xf32> to vector<8x16x128xf32>
    %c0_3 = arith.constant 0 : index
    %c0_4 = arith.constant 0 : index
    %8 = vector.load %arg3[%c0_3, %c0_4] : memref<16x128xf32, #tpu.memory_space<vmem>>, vector<16x128xf32>
    %9 = vector.shape_cast %8 : vector<16x128xf32> to vector<1x16x128xf32>
    %10 = vector.broadcast %9 : vector<1x16x128xf32> to vector<8x16x128xf32>
    %11 = arith.mulf %7, %10 : vector<8x16x128xf32>
    %cst_5 = arith.constant dense<0xFF800000> : vector<8x128xf32>
    %12 = vector.multi_reduction <maximumf>, %11, %cst_5 [1] : vector<8x16x128xf32> to vector<8x128xf32>
    %cst_6 = arith.constant 0.000000e+00 : f32
    %13 = vector.broadcast %cst_6 : f32 to vector<8x128xf32>
    %14 = arith.maximumf %12, %13 : vector<8x128xf32>
    %15 = arith.truncf %14 : vector<8x128xf32> to vector<8x128xbf16>
    %c0_7 = arith.constant 0 : index
    %c0_8 = arith.constant 0 : index
    %16 = vector.load %arg4[%c0_7, %c0_8] : memref<128x128xbf16, #tpu.memory_space<vmem>>, vector<128x128xbf16>
    %cst_9 = arith.constant dense<0.000000e+00> : vector<8x128xf32>
    %17 = tpu.matmul %15, %16, %cst_9 {dimension_numbers = #tpu.dot_dimension_numbers<[1], [0], [0], [1], [0, 0, 1, 1], [], []>} : vector<8x128xbf16>, vector<128x128xbf16>, vector<8x128xf32> -> vector<8x128xf32>
    %c0_10 = arith.constant 0 : index
    %c0_11 = arith.constant 0 : index
    %18 = vector.load %arg5[%c0_10, %c0_11] : memref<1x128xf32, #tpu.memory_space<vmem>>, vector<1x128xf32>
    %19 = vector.broadcast %18 : vector<1x128xf32> to vector<8x128xf32>
    %20 = arith.addf %17, %19 : vector<8x128xf32>
    %21 = arith.index_cast %1 : i32 to index
    %c0_12 = arith.constant 0 : index
    %22 = vector.load %arg6[%21, %c0_12] : memref<8x128xf32, #tpu.memory_space<vmem>>, vector<8x128xf32>
    tpu.vector_store %arg6[%21, %c0_12], %20 {strides = array<i32>} : memref<8x128xf32, #tpu.memory_space<vmem>>, vector<8x128xf32>,
    %c1_i32 = arith.constant 1 : i32
    return
  }
  func.func @transform_0(%arg0: i32) -> (i32, i32, i32) {
    %c0_i32 = arith.constant 0 : i32
    %c0_i32_0 = arith.constant 0 : i32
    %c0_i32_1 = arith.constant 0 : i32
    return %arg0, %c0_i32, %c0_i32_0 : i32, i32, i32
  }
  func.func @transform_1(%arg0: i32) -> (i32, i32) {
    %c0_i32 = arith.constant 0 : i32
    %c0_i32_0 = arith.constant 0 : i32
    %c0_i32_1 = arith.constant 0 : i32
    return %c0_i32, %c0_i32_0 : i32, i32
  }
  func.func @transform_2(%arg0: i32) -> (i32, i32) {
    %c0_i32 = arith.constant 0 : i32
    %c0_i32_0 = arith.constant 0 : i32
    %c0_i32_1 = arith.constant 0 : i32
    return %c0_i32, %c0_i32_0 : i32, i32
  }
  func.func @transform_3(%arg0: i32) -> (i32, i32) {
    %c0_i32 = arith.constant 0 : i32
    %c0_i32_0 = arith.constant 0 : i32
    %c0_i32_1 = arith.constant 0 : i32
    return %c0_i32, %c0_i32_0 : i32, i32
  }
  func.func @transform_4(%arg0: i32) -> (i32, i32) {
    %c0_i32 = arith.constant 0 : i32
    %c0_i32_0 = arith.constant 0 : i32
    %c0_i32_1 = arith.constant 0 : i32
    return %c0_i32, %c0_i32_0 : i32, i32
  }
  func.func @transform_5(%arg0: i32) -> (i32, i32) {
    %c0_i32 = arith.constant 0 : i32
    %c0_i32_0 = arith.constant 0 : i32
    return %arg0, %c0_i32 : i32, i32
  }
}

</mosaic_0001>

<bundles_post_ra>
// kernel: tpu_custom_call.1
= control target key start
LH: loop header
LB: loop body
LE: loop exit
PB: predicated region body
PF: predicated region fallthrough
CT: control target
= control target key end

     0   :  { %10 = vsyncpa [#allocation3], 0  ;;  %s1026_s0 = inlined_call_operand.hbm [shape: bf16[8,16,165], index: 0, kind: input, shape index: {}]   ;;  %s1027_s1 = inlined_call_operand.hbm [shape: bf16[165,128], index: 1, kind: input, shape index: {}]   ;;  %s1028_s2 = inlined_call_operand.hbm [shape: f32[16,128], index: 2, kind: input, shape index: {}]   ;;  %s1029_s3 = inlined_call_operand.hbm [shape: bf16[128,128], index: 3, kind: input, shape index: {}]   ;;  %s1030_s4 = inlined_call_operand.vmem [shape: f32[1,128], index: 4, kind: input, shape index: {}]   ;;  %s1031_s5 = inlined_call_operand.hbm [shape: f32[8,128], index: 5, kind: output, shape index: {}]  }
   0x1   :  { %11 = vsyncpa [#allocation6], 0 }
   0x2   :  { %12 = vsyncpa [#allocation9], 0 }
   0x3   :  { %13 = vsyncpa [#allocation4], 0  ;;  %s879_s18 = smov [#allocation5]   ;;  %s761_s22 = scalar_lea.hbm %s1027_s1, 1344 }
   0x4   :  { %s31_s19 = sshll.u32 %s879_s18, 4  ;;  %p762_p0 = scmp.ne.s32.totalorder %s1027_s1, %s761_s22  ;;  %s32_s19 = int_to_ptr.vmem [resolvable:$true] %s31_s19 }
   0x5   :  { %p765_p1 = scmp.lt.u32.totalorder %s761_s22, %s1027_s1 }
   0x7   :  { %p767_p2 = pnand %p765_p1, %p762_p0 }
   0x9   :  { %770 = shalt.err (!%p767_p2)
}
   0xa   :  { %s771_s27 = scalar_lea.vmem %s32_s19, 1344  ;;  %p776_p4 = scmp.lt.s32.totalorder %s32_s19, %s32_s19 }
   0xb   :  { %p772_p3 = scmp.ne.s32.totalorder %s32_s19, %s771_s27  ;;  %p777_p5 = scmp.lt.s32.totalorder %s771_s27, %s771_s27 }
   0xd   :  { %p778_p6 = por %p777_p5, %p776_p4 }
   0xf   :  { %p779_p7 = pnand %p778_p6, %p772_p3 }
  0x11   :  { %782 = shalt.err (!%p779_p7)
}
  0x12   :  { %s880_s28 = smov 64   ;;  %s881_s29 = smov 4  }
  0x13   :  { %37 = dma.hbm_to_vmem [thread:$0]  %s1027_s1, 1344, %s32_s19, [#allocation6], %s880_s28, %s880_s28, %s881_s29  }
  0x14   :  { %s882_s7 = smov [#allocation2]   ;;  %s783_s11 = scalar_lea.hbm %s1026_s0, 2048 }
  0x15   :  { %s19_s8 = sshll.u32 %s882_s7, 4  ;;  %p784_p8 = scmp.ne.s32.totalorder %s1026_s0, %s783_s11  ;;  %s20_s8 = int_to_ptr.vmem [resolvable:$true] %s19_s8 }
  0x16   :  { %p787_p9 = scmp.lt.u32.totalorder %s783_s11, %s1026_s0 }
  0x18   :  { %p789_p10 = pnand %p787_p9, %p784_p8 }
  0x1a   :  { %792 = shalt.err (!%p789_p10)
}
  0x1b   :  { %s793_s16 = scalar_lea.vmem %s20_s8, 2048  ;;  %p798_p12 = scmp.lt.s32.totalorder %s20_s8, %s20_s8 }
  0x1c   :  { %p794_p11 = scmp.ne.s32.totalorder %s20_s8, %s793_s16  ;;  %p799_p13 = scmp.lt.s32.totalorder %s793_s16, %s793_s16 }
  0x1e   :  { %p800_p0 = por %p799_p13, %p798_p12 }
  0x20   :  { %p801_p1 = pnand %p800_p0, %p794_p11 }
  0x22   :  { %804 = shalt.err (!%p801_p1)
}
  0x23   :  { %s883_s1 = smov 128   ;;  %s884_s17 = smov 8  }
  0x24   :  { %25 = dma.hbm_to_vmem [thread:$0]  %s1026_s0, 2048, %s20_s8, [#allocation3], %s883_s1, %s883_s1, %s884_s17  }
  0x25   :  { %s885_s20 = smov [#allocation7]   ;;  %s886_s22 = smov [#allocation8]  }
  0x26   :  { %s43_s21 = sshll.u32 %s885_s20, 4  ;;  %s55_s23 = sshll.u32 %s886_s22, 4  ;;  %s44_s21 = int_to_ptr.vmem [resolvable:$true] %s43_s21  ;;  %s949_s23 = int_to_ptr.vmem [resolvable:$true] %s55_s23 }
  0x27   :  { %s805_s26 = scalar_lea.hbm %s1028_s2, 256 }
  0x28   :  { %p806_p2 = scmp.ne.s32.totalorder %s1028_s2, %s805_s26  ;;  %p809_p3 = scmp.lt.u32.totalorder %s805_s26, %s1028_s2 }
  0x2a   :  { %p811_p4 = pnand %p809_p3, %p806_p2 }
  0x2c   :  { %814 = shalt.err (!%p811_p4)
}
  0x2d   :  { %s815_s0 = scalar_lea.vmem %s44_s21, 256  ;;  %p820_p6 = scmp.lt.s32.totalorder %s44_s21, %s44_s21 }
  0x2e   :  { %p816_p5 = scmp.ne.s32.totalorder %s44_s21, %s815_s0  ;;  %p821_p7 = scmp.lt.s32.totalorder %s815_s0, %s815_s0 }
  0x30   :  { %p822_p8 = por %p821_p7, %p820_p6 }
  0x32   :  { %p823_p9 = pnand %p822_p8, %p816_p5 }
  0x34   :  { %826 = shalt.err (!%p823_p9)
}
  0x35   :  { %49 = dma.hbm_to_vmem [thread:$0]  %s1028_s2, 256, %s44_s21, [#allocation6], %s883_s1, %s883_s1, %s884_s17  }
  0x36   :  { %s827_s12 = scalar_lea.hbm %s1029_s3, 1024 }
  0x37   :  { %p828_p10 = scmp.ne.s32.totalorder %s1029_s3, %s827_s12  ;;  %p831_p11 = scmp.lt.u32.totalorder %s827_s12, %s1029_s3 }
  0x39   :  { %p833_p12 = pnand %p831_p11, %p828_p10 }
  0x3b   :  { %836 = shalt.err (!%p833_p12)
}
  0x3c   :  { %s837_s18 = scalar_lea.vmem %s949_s23, 1024  ;;  %p842_p0 = scmp.lt.s32.totalorder %s949_s23, %s949_s23 }
  0x3d   :  { %p838_p13 = scmp.ne.s32.totalorder %s949_s23, %s837_s18  ;;  %p843_p1 = scmp.lt.s32.totalorder %s837_s18, %s837_s18 }
  0x3f   :  { %p844_p2 = por %p843_p1, %p842_p0 }
  0x41   :  { %p845_p3 = pnand %p844_p2, %p838_p13 }
  0x43   :  { %848 = shalt.err (!%p845_p3)
}
  0x44   :  { %61 = dma.hbm_to_vmem [thread:$0]  %s1029_s3, 1024, %s949_s23, [#allocation9], %s880_s28, %s880_s28, %s881_s29  }
  0x45   :  { %871 = dma.done.wait [#allocation3], 2048  }
  0x46   :  { %872 = vsyncadd [#allocation3], 4294965248 }
  0x47   :  { %873 = dma.done.wait [#allocation6], 1600  }
  0x48   :  { %874 = vsyncadd [#allocation6], 4294965696 }
  0x49   :  { %875 = dma.done.wait [#allocation9], 1024  }
  0x4a   :  { %876 = vsyncadd [#allocation9], 4294966272  ;;  %v887_v0 = vmov 0   ;;  %v718_v1 = vld [vmem:[#allocation5] sm:$0xff]   ;;  %v719_v2 = vld [vmem:[#allocation5 + $0x8] sm:$0xff]   ;;  %vm252_vm0 = vcmask 302080  }
  0x4b   :  { %284 = vmatprep.subr.bf16.mxu0 %v887_v0  ;;  %v720_v3 = vld [vmem:[#allocation5 + $0x10] sm:$0xff]   ;;  %v721_v4 = vld [vmem:[#allocation5 + $0x18] sm:$0xff]   ;;  %v731_v5 = vld [vmem:[#allocation2 + $0x4] ss:$8 sps:$4 sm:$0xff]   ;;  %vm277_vm1 = vcmask 1041408   ;;  %vm278_vm2 = vcmask 1042432  }
  0x4c   :  { %285 = vmatpush1.bf16.msra.mxu0 %v718_v1  ;;  %659 = vmatprep.mubr.msk.bf16.mxu0 %vm252_vm0, %v731_v5  ;;  %v722_v6 = vld [vmem:[#allocation5 + $0x20] sm:$0xff]   ;;  %v723_v7 = vld [vmem:[#allocation5 + $0x28] sm:$0xff]   ;;  %v724_v8 = vld [vmem:[#allocation5 + $0x30] sm:$0xff]   ;;  %v888_v11 = vmov 65535   ;;  %v889_v33 = vmov 0.0   ;;  %vm890_vm3 = vmmov 0  }
  0x4d   :  { %286 = vmatprep.subr.bf16.mxu0 %v887_v0  ;;  %v725_v9 = vld [vmem:[#allocation5 + $0x38] sm:$0xff]   ;;  %v726_v10 = vld [vmem:[#allocation5 + $0x40] sm:$0xff]   ;;  %v279_v12 = vsel %vm277_vm1, 4294967295, %v888_v11  ;;  %v727_v13 = vld [vmem:[#allocation5 + $0x48] sm:$0xff]   ;;  %685 = vmatprep.subr.bf16.mxu1 %v889_v33  ;;  %vm510_vm4 = vcmask 1041409   ;;  %vm512_vm5 = vcmask 1042434  }
  0x4e   :  { %v728_v14 = vld [vmem:[#allocation5 + $0x50] ss:$0 sps:$4 sm:$0x77]   ;;  %v280_v15 = vsel %vm278_vm2, %v279_v12, 0  ;;  %v729_v17 = vld [vmem:[#allocation2] ss:$8 sps:$4 sm:$0xff]   ;;  %701 = vmatprep.mubr.msk.bf16.mxu1 %vm890_vm3, %v889_v33 }
  0x4f   :  { %v282_v16 = vand.u32 %v728_v14, %v280_v15  ;;  %v732_v18 = vld [vmem:[#allocation2 + $0x14] ss:$8 sps:$4 sm:$0xff]   ;;  %v734_v19 = vld [vmem:[#allocation2 + $0x10] ss:$8 sps:$4 sm:$0xff]   ;;  %v735_v20 = vld [vmem:[#allocation2 + $0x24] ss:$8 sps:$4 sm:$0xff]  }
  0x50   :  { %287 = vmatpush1.bf16.msra.mxu0 %v719_v2  ;;  %v737_v21 = vld [vmem:[#allocation2 + $0x20] ss:$8 sps:$4 sm:$0xff]   ;;  %v738_v22 = vld [vmem:[#allocation2 + $0x34] ss:$8 sps:$4 sm:$0xff]   ;;  %v740_v23 = vld [vmem:[#allocation2 + $0x30] ss:$8 sps:$4 sm:$0xff]  }
  0x51   :  { %288 = vmatprep.subr.bf16.mxu0 %v887_v0  ;;  %v741_v24 = vld [vmem:[#allocation2 + $0x44] ss:$8 sps:$4 sm:$0xff]   ;;  %v743_v25 = vld [vmem:[#allocation2 + $0x40] ss:$8 sps:$4 sm:$0xff]   ;;  %v744_v26 = vld [vmem:[#allocation2 + $0x54] ss:$8 sps:$4 sm:$0xff]  }
  0x52   :  { %v746_v27 = vld [vmem:[#allocation2 + $0x50] ss:$8 sps:$4 sm:$0xff]   ;;  %v747_v28 = vld [vmem:[#allocation2 + $0x64] ss:$8 sps:$4 sm:$0xff]   ;;  %v749_v29 = vld [vmem:[#allocation2 + $0x60] ss:$8 sps:$4 sm:$0xff]  }
  0x53   :  { %v750_v30 = vld [vmem:[#allocation2 + $0x74] ss:$8 sps:$4 sm:$0xff]   ;;  %v752_v31 = vld [vmem:[#allocation2 + $0x70] ss:$8 sps:$4 sm:$0xff]   ;;  %v753_v32 = vld [vmem:[#allocation8] sm:$0xff]   ;;  %vm514_vm6 = vcmask 1043459  }
  0x54   :  { %289 = vmatpush1.bf16.msra.mxu0 %v720_v3  ;;  %686 = vmatpush3.bf16.msra.mxu1 %v753_v32  ;;  %v754_v34 = vld [vmem:[#allocation8 + $0x8] sm:$0xff]   ;;  %v755_v35 = vld [vmem:[#allocation8 + $0x10] sm:$0xff]   ;;  %v756_v36 = vld [vmem:[#allocation8 + $0x18] sm:$0xff]   ;;  %vm516_vm7 = vcmask 1044484   ;;  %vm518_vm8 = vcmask 1045509   ;;  %vm520_vm9 = vcmask 1046534  }
  0x55   :  { %290 = vmatprep.subr.bf16.mxu0 %v887_v0  ;;  %687 = vmatprep.subr.bf16.mxu1 %v889_v33  ;;  %v757_v37 = vld [vmem:[#allocation8 + $0x20] sm:$0xff]   ;;  %v758_v38 = vld [vmem:[#allocation8 + $0x28] sm:$0xff]   ;;  %v759_v39 = vld [vmem:[#allocation8 + $0x30] sm:$0xff]   ;;  %vm522_vm10 = vcmask 1047559   ;;  %s891_s29 = smov [#allocation10]  }
  0x56   :  { %v760_v40 = vld [vmem:[#allocation8 + $0x38] sm:$0xff]   ;;  %v991_v42 = vld [vmem:[#allocation7] sm:$0xff]  ;;  %s621_s17 = sshll.u32 %s891_s29, 4  ;;  %s622_s17 = int_to_ptr.vmem [resolvable:$true] %s621_s17 }
  0x57   :  { %v993_v43 = vld [vmem:[#allocation7 + $0x8] sm:$0xff]  ;;  %s849_s19 = scalar_lea.vmem %s622_s17, 128  ;;  %p854_p5 = scmp.lt.s32.totalorder %s622_s17, %s622_s17 }
  0x58   :  { %291 = vmatpush1.bf16.msra.mxu0 %v721_v4  ;;  %688 = vmatpush3.bf16.msra.mxu1 %v754_v34  ;;  %p850_p4 = scmp.ne.s32.totalorder %s622_s17, %s849_s19  ;;  %p855_p6 = scmp.lt.s32.totalorder %s849_s19, %s849_s19 }
  0x59   :  { %292 = vmatprep.subr.bf16.mxu0 %v887_v0  ;;  %689 = vmatprep.subr.bf16.mxu1 %v889_v33 }
  0x5a   :  { %p856_p7 = por %p855_p6, %p854_p5 }
  0x5c   :  { %293 = vmatpush1.bf16.msra.mxu0 %v722_v6  ;;  %690 = vmatpush3.bf16.msra.mxu1 %v755_v35  ;;  %p857_p8 = pnand %p856_p7, %p850_p4 }
  0x5d   :  { %294 = vmatprep.subr.bf16.mxu0 %v887_v0  ;;  %691 = vmatprep.subr.bf16.mxu1 %v889_v33 }
  0x60   :  { %295 = vmatpush1.bf16.msra.mxu0 %v723_v7  ;;  %692 = vmatpush3.bf16.msra.mxu1 %v756_v36 }
  0x61   :  { %296 = vmatprep.subr.bf16.mxu0 %v887_v0  ;;  %693 = vmatprep.subr.bf16.mxu1 %v889_v33 }
  0x64   :  { %297 = vmatpush1.bf16.msra.mxu0 %v724_v8  ;;  %694 = vmatpush3.bf16.msra.mxu1 %v757_v37 }
  0x65   :  { %298 = vmatprep.subr.bf16.mxu0 %v887_v0  ;;  %695 = vmatprep.subr.bf16.mxu1 %v889_v33 }
  0x68   :  { %299 = vmatpush1.bf16.msra.mxu0 %v725_v9  ;;  %696 = vmatpush3.bf16.msra.mxu1 %v758_v38 }
  0x69   :  { %300 = vmatprep.subr.bf16.mxu0 %v887_v0  ;;  %697 = vmatprep.subr.bf16.mxu1 %v889_v33 }
  0x6c   :  { %301 = vmatpush1.bf16.msra.mxu0 %v726_v10  ;;  %698 = vmatpush3.bf16.msra.mxu1 %v759_v39 }
  0x6d   :  { %302 = vmatprep.subr.bf16.mxu0 %v887_v0  ;;  %699 = vmatprep.subr.bf16.mxu1 %v889_v33 }
  0x70   :  { %303 = vmatpush1.bf16.msra.mxu0 %v727_v13  ;;  %700 = vmatpush3.bf16.msra.mxu1 %v760_v40 }
  0x71   :  { %304 = vmatprep.subr.bf16.mxu0 %v887_v0 }
  0x74   :  { %305 = vmatpush1.bf16.msra.mxu0 %v282_v16 }
  0x77   :  { %317 = vmatmul.mubr.bf16.vlgmr.msra.gmra.mrb[0].mxu0 %v729_v17 }
  0x78   :  { %660 = vmatprep.mubr.msk.bf16.mxu0 %vm252_vm0, %v732_v18 }
  0x7f   :  { %325 = vmatmul.mubr.bf16.gmra.mrb[4].mxu0 %v734_v19 }
  0x80   :  { %661 = vmatprep.mubr.msk.bf16.mxu0 %vm252_vm0, %v735_v20 }
  0x87   :  { %333 = vmatmul.mubr.bf16.gmra.mrb[8].mxu0 %v737_v21 }
  0x88   :  { %662 = vmatprep.mubr.msk.bf16.mxu0 %vm252_vm0, %v738_v22 }
  0x8f   :  { %341 = vmatmul.mubr.bf16.gmra.mrb[12].mxu0 %v740_v23 }
  0x90   :  { %663 = vmatprep.mubr.msk.bf16.mxu0 %vm252_vm0, %v741_v24 }
  0x97   :  { %349 = vmatmul.mubr.bf16.gmra.mrb[16].mxu0 %v743_v25 }
  0x98   :  { %664 = vmatprep.mubr.msk.bf16.mxu0 %vm252_vm0, %v744_v26 }
  0x9f   :  { %357 = vmatmul.mubr.bf16.gmra.mrb[20].mxu0 %v746_v27 }
  0xa0   :  { %665 = vmatprep.mubr.msk.bf16.mxu0 %vm252_vm0, %v747_v28 }
  0xa7   :  { %365 = vmatmul.mubr.bf16.gmra.mrb[24].mxu0 %v749_v29 }
  0xa8   :  { %666 = vmatprep.mubr.msk.bf16.mxu0 %vm252_vm0, %v750_v30 }
  0xaf   :  { %373 = vmatmul.mubr.bf16.gmra.mrb[28].mxu0 %v752_v31 }
 0x14a   :  { %v318_v41 = vpop.f32.mrb[0].mxu0 }
 0x14b   :  { %v320_v44 = vpop.f32.mrb[1].mxu0  ;;  %v383_v46 = vmul.f32 %v991_v42, %v318_v41 }
 0x14c   :  { %v321_v45 = vpop.f32.mrb[2].mxu0 }
 0x14d   :  { %v384_v47 = vmul.f32 %v993_v43, %v321_v45  ;;  %v323_v48 = vpop.f32.mrb[3].mxu0 }
 0x14f   :  { %v399_v49 = vmax.f32 %v383_v46, %v384_v47 }
 0x151   :  { %v400_v50 = vrot.slane %v399_v49, 4 }
 0x152   :  { %v326_v51 = vpop.f32.mrb[4].mxu0 }
 0x153   :  { %v401_v52 = vmax.f32 %v399_v49, %v400_v50  ;;  %v328_v53 = vpop.f32.mrb[5].mxu0  ;;  %v385_v56 = vmul.f32 %v991_v42, %v326_v51 }
 0x154   :  { %v329_v54 = vpop.f32.mrb[6].mxu0 }
 0x155   :  { %v402_v55 = vrot.slane %v401_v52, 2  ;;  %v386_v57 = vmul.f32 %v993_v43, %v329_v54  ;;  %v331_v58 = vpop.f32.mrb[7].mxu0 }
 0x157   :  { %v403_v59 = vmax.f32 %v401_v52, %v402_v55  ;;  %v406_v60 = vmax.f32 %v385_v56, %v386_v57 }
 0x159   :  { %v404_v61 = vrot.slane %v403_v59, 1  ;;  %v407_v62 = vrot.slane %v406_v60, 4 }
 0x15a   :  { %v334_v63 = vpop.f32.mrb[8].mxu0 }
 0x15b   :  { %v408_v0 = vmax.f32 %v406_v60, %v407_v62  ;;  %v336_v1 = vpop.f32.mrb[9].mxu0  ;;  %v405_v2 = vmax.f32 %v403_v59, %v404_v61  ;;  %v387_v5 = vmul.f32 %v991_v42, %v334_v63 }
 0x15c   :  { %v337_v3 = vpop.f32.mrb[10].mxu0 }
 0x15d   :  { %v409_v4 = vrot.slane %v408_v0, 2  ;;  %v388_v6 = vmul.f32 %v993_v43, %v337_v3  ;;  %v339_v7 = vpop.f32.mrb[11].mxu0  ;;  %v455_v10 = vmax.f32 %v405_v2, 0.0 }
 0x15f   :  { %v410_v8 = vmax.f32 %v408_v0, %v409_v4  ;;  %v413_v9 = vmax.f32 %v387_v5, %v388_v6  ;;  %v463_v17 = vpack.c.bf16 %v455_v10, %v455_v10 }
 0x161   :  { %v411_v11 = vrot.slane %v410_v8, 1  ;;  %v414_v12 = vrot.slane %v413_v9, 4  ;;  %v502_v27 = vunpack.c.l.b16 %v463_v17 }
 0x162   :  { %v342_v13 = vpop.f32.mrb[12].mxu0 }
 0x163   :  { %v412_v14 = vmax.f32 %v410_v8, %v411_v11  ;;  %v415_v15 = vmax.f32 %v413_v9, %v414_v12  ;;  %v344_v16 = vpop.f32.mrb[13].mxu0  ;;  %v389_v21 = vmul.f32 %v991_v42, %v342_v13 }
 0x164   :  { %v345_v18 = vpop.f32.mrb[14].mxu0 }
 0x165   :  { %v456_v19 = vmax.f32 %v412_v14, 0.0  ;;  %v416_v20 = vrot.slane %v415_v15, 2  ;;  %v390_v22 = vmul.f32 %v993_v43, %v345_v18  ;;  %v347_v23 = vpop.f32.mrb[15].mxu0 }
 0x167   :  { %v464_v24 = vpack.c.bf16 %v456_v19, %v456_v19  ;;  %v417_v25 = vmax.f32 %v415_v15, %v416_v20  ;;  %v420_v26 = vmax.f32 %v389_v21, %v390_v22 }
 0x169   :  { %v503_v28 = vunpack.c.l.b16 %v464_v24  ;;  %v418_v29 = vrot.slane %v417_v25, 1  ;;  %v421_v30 = vrot.slane %v420_v26, 4 }
 0x16a   :  { %v350_v31 = vpop.f32.mrb[16].mxu0 }
 0x16b   :  { %v511_v32 = vsel %vm510_vm4, %v503_v28, %v502_v27  ;;  %v419_v33 = vmax.f32 %v417_v25, %v418_v29  ;;  %v422_v34 = vmax.f32 %v420_v26, %v421_v30  ;;  %v352_v35 = vpop.f32.mrb[17].mxu0  ;;  %v391_v39 = vmul.f32 %v991_v42, %v350_v31 }
 0x16c   :  { %v353_v36 = vpop.f32.mrb[18].mxu0 }
 0x16d   :  { %v457_v37 = vmax.f32 %v419_v33, 0.0  ;;  %v423_v38 = vrot.slane %v422_v34, 2  ;;  %v392_v40 = vmul.f32 %v993_v43, %v353_v36  ;;  %v355_v41 = vpop.f32.mrb[19].mxu0 }
 0x16f   :  { %v465_v44 = vpack.c.bf16 %v457_v37, %v457_v37  ;;  %v424_v45 = vmax.f32 %v422_v34, %v423_v38  ;;  %v427_v46 = vmax.f32 %v391_v39, %v392_v40 }
 0x171   :  { %v504_v47 = vunpack.c.l.b16 %v465_v44  ;;  %v425_v48 = vrot.slane %v424_v45, 1  ;;  %v428_v49 = vrot.slane %v427_v46, 4 }
 0x172   :  { %v358_v50 = vpop.f32.mrb[20].mxu0 }
 0x173   :  { %v513_v51 = vsel %vm512_vm5, %v504_v47, %v511_v32  ;;  %v426_v52 = vmax.f32 %v424_v45, %v425_v48  ;;  %v429_v53 = vmax.f32 %v427_v46, %v428_v49  ;;  %v360_v54 = vpop.f32.mrb[21].mxu0  ;;  %v393_v58 = vmul.f32 %v991_v42, %v358_v50 }
 0x174   :  { %v361_v55 = vpop.f32.mrb[22].mxu0 }
 0x175   :  { %v458_v56 = vmax.f32 %v426_v52, 0.0  ;;  %v430_v57 = vrot.slane %v429_v53, 2  ;;  %v394_v59 = vmul.f32 %v993_v43, %v361_v55  ;;  %v363_v60 = vpop.f32.mrb[23].mxu0 }
 0x177   :  { %v466_v61 = vpack.c.bf16 %v458_v56, %v458_v56  ;;  %v431_v62 = vmax.f32 %v429_v53, %v430_v57  ;;  %v434_v63 = vmax.f32 %v393_v58, %v394_v59  ;;  %v667_v53 = vld [vmem:[%s1030_s4] ss:$0 sm:$0xff] }
 0x179   :  { %v505_v0 = vunpack.c.l.b16 %v466_v61  ;;  %v432_v1 = vrot.slane %v431_v62, 1  ;;  %v435_v2 = vrot.slane %v434_v63, 4 }
 0x17a   :  { %v366_v3 = vpop.f32.mrb[24].mxu0 }
 0x17b   :  { %v433_v4 = vmax.f32 %v431_v62, %v432_v1  ;;  %v436_v5 = vmax.f32 %v434_v63, %v435_v2  ;;  %v368_v6 = vpop.f32.mrb[25].mxu0  ;;  %v515_v7 = vsel %vm514_vm6, %v505_v0, %v513_v51  ;;  %v395_v11 = vmul.f32 %v991_v42, %v366_v3 }
 0x17c   :  { %v369_v8 = vpop.f32.mrb[26].mxu0 }
 0x17d   :  { %v459_v9 = vmax.f32 %v433_v4, 0.0  ;;  %v437_v10 = vrot.slane %v436_v5, 2  ;;  %v396_v12 = vmul.f32 %v993_v43, %v369_v8  ;;  %v371_v13 = vpop.f32.mrb[27].mxu0 }
 0x17f   :  { %v467_v14 = vpack.c.bf16 %v459_v9, %v459_v9  ;;  %v438_v15 = vmax.f32 %v436_v5, %v437_v10  ;;  %v441_v16 = vmax.f32 %v395_v11, %v396_v12 }
 0x181   :  { %v506_v17 = vunpack.c.l.b16 %v467_v14  ;;  %v439_v18 = vrot.slane %v438_v15, 1  ;;  %v442_v19 = vrot.slane %v441_v16, 4 }
 0x182   :  { %v374_v20 = vpop.f32.mrb[28].mxu0 }
 0x183   :  { %v440_v21 = vmax.f32 %v438_v15, %v439_v18  ;;  %v443_v22 = vmax.f32 %v441_v16, %v442_v19  ;;  %v376_v23 = vpop.f32.mrb[29].mxu0  ;;  %v517_v24 = vsel %vm516_vm7, %v506_v17, %v515_v7  ;;  %v397_v28 = vmul.f32 %v991_v42, %v374_v20 }
 0x184   :  { %v377_v25 = vpop.f32.mrb[30].mxu0 }
 0x185   :  { %v460_v26 = vmax.f32 %v440_v21, 0.0  ;;  %v444_v27 = vrot.slane %v443_v22, 2  ;;  %v398_v29 = vmul.f32 %v993_v43, %v377_v25  ;;  %v379_v30 = vpop.f32.mrb[31].mxu0 }
 0x187   :  { %v468_v31 = vpack.c.bf16 %v460_v26, %v460_v26  ;;  %v445_v32 = vmax.f32 %v443_v22, %v444_v27  ;;  %v448_v33 = vmax.f32 %v397_v28, %v398_v29 }
 0x189   :  { %v507_v34 = vunpack.c.l.b16 %v468_v31  ;;  %v446_v35 = vrot.slane %v445_v32, 1  ;;  %v449_v36 = vrot.slane %v448_v33, 4 }
 0x18b   :  { %v447_v37 = vmax.f32 %v445_v32, %v446_v35  ;;  %v450_v38 = vmax.f32 %v448_v33, %v449_v36  ;;  %v519_v39 = vsel %vm518_vm8, %v507_v34, %v517_v24 }
 0x18d   :  { %v461_v40 = vmax.f32 %v447_v37, 0.0  ;;  %v451_v41 = vrot.slane %v450_v38, 2 }
 0x18f   :  { %v469_v44 = vpack.c.bf16 %v461_v40, %v461_v40  ;;  %v452_v45 = vmax.f32 %v450_v38, %v451_v41 }
 0x191   :  { %v508_v46 = vunpack.c.l.b16 %v469_v44  ;;  %v453_v42 = vrot.slane %v452_v45, 1 }
 0x193   :  { %v454_v47 = vmax.f32 %v452_v45, %v453_v42  ;;  %v521_v43 = vsel %vm520_vm9, %v508_v46, %v519_v39 }
 0x195   :  { %v462_v48 = vmax.f32 %v454_v47, 0.0 }
 0x197   :  { %v470_v49 = vpack.c.bf16 %v462_v48, %v462_v48 }
 0x199   :  { %v509_v50 = vunpack.c.l.b16 %v470_v49 }
 0x19b   :  { %v523_v51 = vsel %vm522_vm10, %v509_v50, %v521_v43 }
 0x19c   :  { %v524_v52 = vpack.c.b16 %v523_v51, %v523_v51 }
 0x19e   :  { %702 = vmatmul.mubr.bf16.vlgmr.msra.gmra.mrb[0].mxu1 %v524_v52 }
 0x271   :  { %v608_v54 = vpop.f32.mrb[0].mxu1 }
 0x272   :  { %v609_v55 = vadd.f32 %v667_v53, %v608_v54  ;;  %v703_v56 = vpop.f32.mrb[1].mxu1 }
 0x273   :  { %v611_v57 = vpop.f32.mrb[2].mxu1 }
 0x274   :  { %614 = vst [vmem:[#allocation10] sm:$0xff] %v609_v55  ;;  %v704_v58 = vpop.f32.mrb[3].mxu1 }
 0x275   :  { %860 = shalt.err (!%p857_p8)
}
 0x276   :  { %s861_s4 = scalar_lea.hbm %s1031_s5, 128 }
 0x277   :  { %p862_p9 = scmp.ne.s32.totalorder %s1031_s5, %s861_s4  ;;  %p865_p10 = scmp.lt.u32.totalorder %s861_s4, %s1031_s5 }
 0x279   :  { %p867_p11 = pnand %p865_p10, %p862_p9 }
 0x27b   :  { %870 = shalt.err (!%p867_p11)
}
 0x27c   :  { %624 = dma.vmem_to_hbm [thread:$0]  %s622_s17, 128, %s1031_s5, [#allocation4]  }
 0x27d   :  { %877 = dma.done.wait [#allocation4], 128  }
 0x27e   :  { %878 = vsyncadd [#allocation4], 4294967168 }
 0x27f   :  { %628 = vsyncpa [#allocation3], 1 }
 0x280   :  { %629 = vsyncpa [#allocation6], 1 }
 0x281   :  { %630 = vsyncpa [#allocation9], 1 }
 0x282   :  { %631 = vsyncpa [#allocation4], 1 }

</bundles_post_ra>
